<compile_context>
chip_gen: v5e
topology: v5e:2x2
jax: 0.10.0
libtpu: 0.0.40
codegen_flags: <defaults>
</compile_context>

<pallas_src>
from functools import lru_cache

import numpy as np
import jax
import jax.numpy as jnp
from jax.experimental import pallas as pl
from jax.experimental.pallas import tpu as pltpu

POOL_SIZES = (1, 2, 3, 6)
_LANE = 128


# ---------------------- host-side (glue) operator construction ----------------------
def _adaptive_pool_matrix(in_size, out_size):
    """P[i, h] = 1/len(bin_i) if h in bin_i — matches nn.AdaptiveAvgPool2d."""
    P = np.zeros((out_size, in_size), dtype=np.float32)
    for i in range(out_size):
        start = (i * in_size) // out_size
        end = -((-(i + 1) * in_size) // out_size)  # ceil
        P[i, start:end] = 1.0 / (end - start)
    return P


def _bilinear_up_matrix(out_size, in_size):
    """U[y, i] = bilinear weight, align_corners=True (F.interpolate)."""
    U = np.zeros((out_size, in_size), dtype=np.float32)
    if in_size == 1:
        U[:, 0] = 1.0
        return U
    scale = (in_size - 1) / (out_size - 1)
    for y in range(out_size):
        src = y * scale
        i0 = int(np.floor(src))
        i1 = min(i0 + 1, in_size - 1)
        frac = src - i0
        U[y, i0] += 1.0 - frac
        U[y, i1] += frac
    return U


@lru_cache(maxsize=None)
def _stage_operators(H, W, C, pool_sizes):
    """Fused all-stage pooling (A_all^T), upsample (B_all^T) and stage block-mask
    operators, built once per (H, W, C, pool_sizes).  The flat spatial axis is
    zero-padded to a multiple of 128 lanes; padded rows/cols are zero so they
    never leak into the math.  Kept in f32 (tiny; accuracy of 1/bin and
    bilinear weights preserved)."""
    n_stages = len(pool_sizes)
    Cout = C // n_stages
    HW = H * W
    HW_pad = ((HW + _LANE - 1) // _LANE) * _LANE
    s2_tot = sum(s * s for s in pool_sizes)          # 50 for (1,2,3,6)
    S2P = max(_LANE, ((s2_tot + _LANE - 1) // _LANE) * _LANE)

    a_all_t = np.zeros((HW_pad, S2P), dtype=np.float32)   # pooling, A_all^T
    b_all_t = np.zeros((S2P, HW_pad), dtype=np.float32)   # upsample, B_all^T
    mask = np.zeros((n_stages * Cout, S2P), dtype=np.float32)

    off = 0
    for idx, s in enumerate(pool_sizes):
        A = np.kron(_adaptive_pool_matrix(H, s), _adaptive_pool_matrix(W, s))  # (s*s, HW)
        B = np.kron(_bilinear_up_matrix(H, s), _bilinear_up_matrix(W, s))      # (HW, s*s)
        a_all_t[:HW, off:off + s * s] = A.T
        b_all_t[off:off + s * s, :HW] = B.T
        mask[idx * Cout:(idx + 1) * Cout, off:off + s * s] = 1.0
        off += s * s

    return (jnp.asarray(a_all_t), jnp.asarray(b_all_t), jnp.asarray(mask))


def _vmem_limit_bytes():
    """3/4 of per-TensorCore VMEM, clamped at 64 MiB so v7x (64 MiB per TC) is
    safe even if get_tpu_info reports per-chip capacity."""
    cap = 64 * 1024 * 1024
    try:
        cap = min(cap, int(pltpu.get_tpu_info().vmem_capacity_bytes))
    except Exception:
        pass
    return (cap * 3) // 4


def _pick_hw_tile(HW_pad, C, Ctot, in_bytes, out_bytes, vmem_limit):
    """Largest lane-dense (multiple-of-128) divisor of the padded HW whose
    double-buffered per-tile blocks use at most half the VMEM budget."""
    budget = vmem_limit // 2
    best = _LANE
    t = _LANE
    while t <= min(HW_pad, 2048):
        if HW_pad % t == 0:
            per_tile = 2 * t * (C * in_bytes + Ctot * out_bytes + _LANE * 4)
            if per_tile <= budget:
                best = t
        t += _LANE
    return best


# ------------------------------------ kernels ------------------------------------
def _pool_conv_kernel(x_ref, at_ref, w_ref, m_ref, y_ref, pooled_acc):
    # x_ref : (C, hw_tile)    input dtype — one lane-dense spatial tile of x
    # at_ref: (hw_tile, S2P)  f32 — matching rows of the packed pooling matrix
    # w_ref : (SR, C)         f32 — stacked 1x1 conv weights (SR = 4*Cout)
    # m_ref : (SR, S2P)       f32 — block mask keeping each stage's own columns
    # y_ref : (SR, S2P)       f32 — per-batch pooled+conv result (resident over t)
    # pooled_acc: (C, S2P)    f32 scratch — pooling accumulator across HW tiles
    t = pl.program_id(1)

    @pl.when(t == 0)
    def _():
        pooled_acc[...] = jnp.zeros_like(pooled_acc)

    pooled_acc[...] += jnp.dot(x_ref[...].astype(jnp.float32), at_ref[...],
                               preferred_element_type=jnp.float32)

    @pl.when(t == pl.num_programs(1) - 1)
    def _():
        y = jnp.dot(w_ref[...], pooled_acc[...], preferred_element_type=jnp.float32)
        y_ref[...] = y * m_ref[...]


def _upsample_concat_kernel(x_ref, y_ref, bt_ref, o_ref):
    # x_ref : (C, hw_tile)     input dtype — passthrough tile (bit-exact copy)
    # y_ref : (SR, S2P)        f32 — all-stage pooled+conv values for this batch
    # bt_ref: (S2P, hw_tile)   f32 — packed upsample matrix, this spatial tile
    # o_ref : (C+SR, hw_tile)  input dtype — concatenated output tile
    C = x_ref.shape[0]
    o_ref[:C, :] = x_ref[...].astype(o_ref.dtype)          # no-op cast: same dtype
    o_ref[C:, :] = jnp.dot(y_ref[...], bt_ref[...],
                           preferred_element_type=jnp.float32).astype(o_ref.dtype)


# ------------------------------------ wrapper ------------------------------------
def pyramid_pooling_module(x, conv_weights, pool_sizes=POOL_SIZES):
    """x: (N, C, H, W); conv_weights: list of (C//len(pool_sizes), C) 1x1 conv
    weights (no bias). Returns (N, C + n_stages*(C//n_stages), H, W) in x.dtype."""
    N, C, H, W = x.shape
    n_stages = len(pool_sizes)
    assert C >= n_stages, "need at least one output channel per stage"
    Cout = C // n_stages
    SR = n_stages * Cout
    Ctot = C + SR
    HW = H * W
    HW_pad = ((HW + _LANE - 1) // _LANE) * _LANE

    a_t, b_t, mask = _stage_operators(H, W, C, tuple(pool_sizes))
    S2P = a_t.shape[1]
    w_stk = jnp.concatenate(list(conv_weights), axis=0).astype(jnp.float32)  # (SR, C)

    out_dtype = x.dtype
    itemsize = jnp.dtype(x.dtype).itemsize
    vmem_limit = _vmem_limit_bytes()
    hw_tile = _pick_hw_tile(HW_pad, C, Ctot, itemsize, itemsize, vmem_limit)
    n_hw = HW_pad // hw_tile

    x_flat = x.reshape(N, C, HW)
    if HW_pad != HW:
        # Lane-pad the flat spatial axis so every store is lane-dense; the
        # operators are zero over the padding, so results are unchanged.
        x_flat = jnp.pad(x_flat, ((0, 0), (0, 0), (0, HW_pad - HW)))

    # ---- pass 1: adaptive average pooling + 1x1 conv for all stages at once ----
    y = pl.pallas_call(
        _pool_conv_kernel,
        out_shape=jax.ShapeDtypeStruct((N, SR, S2P), jnp.float32),
        grid_spec=pltpu.PrefetchScalarGridSpec(
            num_scalar_prefetch=0,
            grid=(N, n_hw),
            in_specs=[
                pl.BlockSpec((pl.Squeezed(), C, hw_tile), lambda n, t: (n, 0, t)),
                pl.BlockSpec((hw_tile, S2P), lambda n, t: (t, 0)),
                pl.BlockSpec((SR, C), lambda n, t: (0, 0)),
                pl.BlockSpec((SR, S2P), lambda n, t: (0, 0)),
            ],
            out_specs=pl.BlockSpec((pl.Squeezed(), SR, S2P), lambda n, t: (n, 0, 0)),
            scratch_shapes=[pltpu.VMEM((C, S2P), jnp.float32)],
        ),
        compiler_params=pltpu.CompilerParams(
            dimension_semantics=("parallel", "arbitrary"),
            vmem_limit_bytes=vmem_limit,
        ),
    )(x_flat, a_t, w_stk, mask)

    # ---- pass 2: bilinear upsample of all stages + fused concat write ----
    out = pl.pallas_call(
        _upsample_concat_kernel,
        out_shape=jax.ShapeDtypeStruct((N, Ctot, HW_pad), out_dtype),
        grid_spec=pltpu.PrefetchScalarGridSpec(
            num_scalar_prefetch=0,
            grid=(N, n_hw),
            in_specs=[
                pl.BlockSpec((pl.Squeezed(), C, hw_tile), lambda n, t: (n, 0, t)),
                pl.BlockSpec((pl.Squeezed(), SR, S2P), lambda n, t: (n, 0, 0)),
                pl.BlockSpec((S2P, hw_tile), lambda n, t: (0, t)),
            ],
            out_specs=pl.BlockSpec((pl.Squeezed(), Ctot, hw_tile),
                                   lambda n, t: (n, 0, t)),
        ),
        compiler_params=pltpu.CompilerParams(
            # Both axes are independent: lets megacore split HW too when N is small.
            dimension_semantics=("parallel", "parallel"),
            vmem_limit_bytes=vmem_limit,
        ),
    )(x_flat, y, b_t)

    if HW_pad != HW:
        out = out[:, :, :HW]
    return out.reshape(N, Ctot, H, W)


# ----------------- pure-JAX reference (mirrors PyTorch forward) ----------------
def _ref_adaptive_pool(x, s):
    N, C, H, W = x.shape
    rows = []
    for i in range(s):
        h0 = (i * H) // s
        h1 = -((-(i + 1) * H) // s)
        cols = []
        for j in range(s):
            w0 = (j * W) // s
            w1 = -((-(j + 1) * W) // s)
            cols.append(jnp.mean(x[:, :, h0:h1, w0:w1], axis=(2, 3)))
        rows.append(jnp.stack(cols, axis=-1))
    return jnp.stack(rows, axis=-2)


def _ref_bilinear_up(y, H, W):
    N, C, s, _ = y.shape
    if s == 1:
        return jnp.broadcast_to(y, (N, C, H, W))
    ys = jnp.arange(H) * (s - 1) / (H - 1)
    xs = jnp.arange(W) * (s - 1) / (W - 1)
    y0 = jnp.floor(ys).astype(jnp.int32); y1 = jnp.minimum(y0 + 1, s - 1)
    x0 = jnp.floor(xs).astype(jnp.int32); x1 = jnp.minimum(x0 + 1, s - 1)
    fy = (ys - y0)[None, None, :, None]
    fx = (xs - x0)[None, None, None, :]
    g = lambda yi, xi: y[:, :, yi, :][:, :, :, xi]
    top = g(y0, x0) * (1 - fx) + g(y0, x1) * fx
    bot = g(y1, x0) * (1 - fx) + g(y1, x1) * fx
    return top * (1 - fy) + bot * fy


def ref_ppm(x, conv_weights, pool_sizes=POOL_SIZES):
    N, C, H, W = x.shape
    outs = [x]
    for s, w in zip(pool_sizes, conv_weights):
        pooled = _ref_adaptive_pool(x, s)
        conv = jnp.einsum("oc,nchw->nohw", w, pooled)
        outs.append(_ref_bilinear_up(conv, H, W))
    return jnp.concatenate(outs, axis=1)


if __name__ == "__main__":
    key = jax.random.PRNGKey(0)
    n_stages = len(POOL_SIZES)

    def run_case(case_idx, N, C, H, W, dtype, tol):
        Cout = C // n_stages
        kx, *kws = jax.random.split(jax.random.fold_in(key, case_idx), 1 + n_stages)
        x32 = jax.random.normal(kx, (N, C, H, W), dtype=jnp.float32)
        conv_weights = [jax.random.normal(k, (Cout, C), dtype=jnp.float32) * 0.1
                        for k in kws]
        x_in = x32.astype(dtype)
        out = jax.block_until_ready(pyramid_pooling_module(x_in, conv_weights))
        assert out.shape == (N, C + Cout * n_stages, H, W)
        assert out.dtype == dtype
        ref = ref_ppm(x_in.astype(jnp.float32), conv_weights)
        np.testing.assert_allclose(np.asarray(out, dtype=np.float32),
                                   np.asarray(ref), rtol=tol, atol=tol)

    # multi-tile, lane-aligned case: HW = 2304 -> two 1152-wide lane tiles
    run_case(0, 2, 8, 48, 48, jnp.float32, 2e-2)
    # spatial size not a multiple of 128 -> exercises the lane-padding path
    run_case(1, 1, 8, 18, 17, jnp.float32, 2e-2)
    # bf16 activations -> bf16 output (halved HBM read/write streams)
    run_case(2, 2, 8, 32, 32, jnp.bfloat16, 3e-2)

    print("KERNEL_OK")
</pallas_src>

<mosaic_0001>
module attributes {stable_mosaic.version = 11 : i64} {
  func.func @_pool_conv_kernel(%arg0: i32, %arg1: i32, %arg2: memref<1x8x1152xf32, #tpu.memory_space<vmem>>, %arg3: memref<1152x128xf32, #tpu.memory_space<vmem>>, %arg4: memref<8x8xf32, #tpu.memory_space<vmem>>, %arg5: memref<8x128xf32, #tpu.memory_space<vmem>>, %arg6: memref<1x8x128xf32, #tpu.memory_space<vmem>>, %arg7: memref<8x128xf32, #tpu.memory_space<vmem>>) attributes {dimension_semantics = [#tpu.dimension_semantics<parallel>, #tpu.dimension_semantics<arbitrary>], iteration_bounds = array<i64: 2, 2>, scalar_prefetch = 0 : i64, scratch_operands = 1 : i64, tpu.core_type = #tpu.core_type<tc>, window_params = [{transform_indices = @transform_0, window_bounds = array<i64: 1, 8, 1152>}, {transform_indices = @transform_1, window_bounds = array<i64: 1152, 128>}, {pipeline_mode = #tpu.pipeline_mode<synchronous>, transform_indices = @transform_2, window_bounds = array<i64: 8, 8>}, {pipeline_mode = #tpu.pipeline_mode<synchronous>, transform_indices = @transform_3, window_bounds = array<i64: 8, 128>}, {transform_indices = @transform_4, window_bounds = array<i64: 1, 8, 128>}]} {
    %c0_i32 = arith.constant 0 : i32
    %0 = arith.cmpi eq, %arg1, %c0_i32 : i32
    %1 = arith.extui %0 : i1 to i32
    %c0_i32_0 = arith.constant 0 : i32
    %2 = arith.cmpi ne, %1, %c0_i32_0 : i32
    scf.if %2 {
      %cst_10 = arith.constant 0.000000e+00 : f32
      %13 = vector.broadcast %cst_10 : f32 to vector<8x128xf32>
      %c0_11 = arith.constant 0 : index
      %c0_12 = arith.constant 0 : index
      %14 = vector.load %arg7[%c0_11, %c0_12] : memref<8x128xf32, #tpu.memory_space<vmem>>, vector<8x128xf32>
      tpu.vector_store %arg7[%c0_11, %c0_12], %13 {strides = array<i32>} : memref<8x128xf32, #tpu.memory_space<vmem>>, vector<8x128xf32>,
    } else {
    }
    %c0 = arith.constant 0 : index
    %c0_1 = arith.constant 0 : index
    %3 = vector.load %arg7[%c0, %c0_1] : memref<8x128xf32, #tpu.memory_space<vmem>>, vector<8x128xf32>
    %c0_2 = arith.constant 0 : index
    %c0_3 = arith.constant 0 : index
    %c0_4 = arith.constant 0 : index
    %4 = vector.load %arg2[%c0_2, %c0_3, %c0_4] : memref<1x8x1152xf32, #tpu.memory_space<vmem>>, vector<1x8x1152xf32>
    %5 = vector.shape_cast %4 : vector<1x8x1152xf32> to vector<8x1152xf32>
    %c0_5 = arith.constant 0 : index
    %c0_6 = arith.constant 0 : index
    %6 = vector.load %arg3[%c0_5, %c0_6] : memref<1152x128xf32, #tpu.memory_space<vmem>>, vector<1152x128xf32>
    %cst = arith.constant dense<0.000000e+00> : vector<8x128xf32>
    %7 = tpu.matmul %5, %6, %cst {dimension_numbers = #tpu.dot_dimension_numbers<[1], [0], [0], [1], [0, 0, 1, 1], [], []>} : vector<8x1152xf32>, vector<1152x128xf32>, vector<8x128xf32> -> vector<8x128xf32>
    %8 = arith.addf %3, %7 : vector<8x128xf32>
    %c0_7 = arith.constant 0 : index
    %c0_8 = arith.constant 0 : index
    %9 = vector.load %arg7[%c0_7, %c0_8] : memref<8x128xf32, #tpu.memory_space<vmem>>, vector<8x128xf32>
    tpu.vector_store %arg7[%c0_7, %c0_8], %8 {strides = array<i32>} : memref<8x128xf32, #tpu.memory_space<vmem>>, vector<8x128xf32>,
    %c1_i32 = arith.constant 1 : i32
    %10 = arith.cmpi eq, %arg1, %c1_i32 : i32
    %11 = arith.extui %10 : i1 to i32
    %c0_i32_9 = arith.constant 0 : i32
    %12 = arith.cmpi ne, %11, %c0_i32_9 : i32
    scf.if %12 {
      %c0_10 = arith.constant 0 : index
      %c0_11 = arith.constant 0 : index
      %13 = vector.load %arg4[%c0_10, %c0_11] : memref<8x8xf32, #tpu.memory_space<vmem>>, vector<8x8xf32>
      %c0_12 = arith.constant 0 : index
      %c0_13 = arith.constant 0 : index
      %14 = vector.load %arg7[%c0_12, %c0_13] : memref<8x128xf32, #tpu.memory_space<vmem>>, vector<8x128xf32>
      %cst_14 = arith.constant dense<0.000000e+00> : vector<8x128xf32>
      %15 = tpu.matmul %13, %14, %cst_14 {dimension_numbers = #tpu.dot_dimension_numbers<[1], [0], [0], [1], [0, 0, 1, 1], [], []>} : vector<8x8xf32>, vector<8x128xf32>, vector<8x128xf32> -> vector<8x128xf32>
      %c0_15 = arith.constant 0 : index
      %c0_16 = arith.constant 0 : index
      %16 = vector.load %arg5[%c0_15, %c0_16] : memref<8x128xf32, #tpu.memory_space<vmem>>, vector<8x128xf32>
      %17 = arith.mulf %15, %16 : vector<8x128xf32>
      %c0_17 = arith.constant 0 : index
      %c0_18 = arith.constant 0 : index
      %c0_19 = arith.constant 0 : index
      %18 = vector.load %arg6[%c0_17, %c0_18, %c0_19] : memref<1x8x128xf32, #tpu.memory_space<vmem>>, vector<1x8x128xf32>
      %19 = vector.shape_cast %18 : vector<1x8x128xf32> to vector<8x128xf32>
      %20 = vector.shape_cast %17 : vector<8x128xf32> to vector<1x8x128xf32>
      tpu.vector_store %arg6[%c0_17, %c0_18, %c0_19], %20 {strides = array<i32>} : memref<1x8x128xf32, #tpu.memory_space<vmem>>, vector<1x8x128xf32>,
    } else {
    }
    return
  }
  func.func @transform_0(%arg0: i32, %arg1: i32) -> (i32, i32, i32) {
    %c0_i32 = arith.constant 0 : i32
    %c0_i32_0 = arith.constant 0 : i32
    return %arg0, %c0_i32, %arg1 : i32, i32, i32
  }
  func.func @transform_1(%arg0: i32, %arg1: i32) -> (i32, i32) {
    %c0_i32 = arith.constant 0 : i32
    %c0_i32_0 = arith.constant 0 : i32
    return %arg1, %c0_i32 : i32, i32
  }
  func.func @transform_2(%arg0: i32, %arg1: i32) -> (i32, i32) {
    %c0_i32 = arith.constant 0 : i32
    %c0_i32_0 = arith.constant 0 : i32
    %c0_i32_1 = arith.constant 0 : i32
    return %c0_i32, %c0_i32_0 : i32, i32
  }
  func.func @transform_3(%arg0: i32, %arg1: i32) -> (i32, i32) {
    %c0_i32 = arith.constant 0 : i32
    %c0_i32_0 = arith.constant 0 : i32
    %c0_i32_1 = arith.constant 0 : i32
    return %c0_i32, %c0_i32_0 : i32, i32
  }
  func.func @transform_4(%arg0: i32, %arg1: i32) -> (i32, i32, i32) {
    %c0_i32 = arith.constant 0 : i32
    %c0_i32_0 = arith.constant 0 : i32
    %c0_i32_1 = arith.constant 0 : i32
    return %arg0, %c0_i32, %c0_i32_0 : i32, i32, i32
  }
}

</mosaic_0001>

<bundles_post_ra>
// kernel: tpu_custom_call.1
= control target key start
LH: loop header
LB: loop body
LE: loop exit
PB: predicated region body
PF: predicated region fallthrough
CT: control target
= control target key end

     0   :  { %s1749_s0 = inlined_call_operand.hbm [shape: f32[2,8,2304], index: 0, kind: input, shape index: {}]   ;;  %s1750_s1 = inlined_call_operand.hbm [shape: f32[2304,128], index: 1, kind: input, shape index: {}]   ;;  %s1751_s2 = inlined_call_operand.hbm [shape: f32[8,8], index: 2, kind: input, shape index: {}]   ;;  %s1752_s3 = inlined_call_operand.hbm [shape: f32[8,128], index: 3, kind: input, shape index: {}]   ;;  %s1753_s4 = inlined_call_operand.hbm [shape: f32[2,8,128], index: 4, kind: output, shape index: {}]  }
   0x1   :  { %1767 = sst [smem:[#allocation31_spill]] %s1751_s2 }
   0x2   :  { %1768 = sst [smem:[#allocation32_spill]] %s1752_s3 }
   0x3   :  { %1769 = sst [smem:[#allocation33_spill]] %s1753_s4 }
   0x4   :  { %9 = vsyncpa [#allocation4], 0 }
   0x5   :  { %11 = vsyncpa [#allocation4 + $0x1], 0 }
   0x6   :  { %12 = vsyncpa [#allocation7], 0 }
   0x7   :  { %14 = vsyncpa [#allocation7 + $0x1], 0 }
   0x8   :  { %15 = vsyncpa [#allocation10], 0 }
   0x9   :  { %16 = vsyncpa [#allocation5], 0 }
   0xa   :  { %18 = vsyncpa [#allocation5 + $0x1], 0  ;;  %s1311_s15 = smov 0   ;;  %s1313_s16 = smov 0  }
   0xb   :  { %s1315_s17 = smov 0   ;;  %s1317_s18 = smov 0  }
   0xc   :  { %s1319_s19 = smov 0   ;;  %s1321_s20 = smov 0  }
   0xd   :  { %s1323_s21 = smov 0   ;;  %s1325_s22 = smov 0  }
   0xe   :  { %s1327_s23 = smov 0   ;;  %s1329_s24 = smov 0  }
   0xf   :  { %s1331_s25 = smov 0   ;;  %s1333_s26 = smov 0  }
  0x10   :  { %s1335_s27 = smov 0   ;;  %s1337_s28 = smov 0  }
  0x11 LB: > { %1770 = sst [smem:[#allocation17_spill]] %s1227_s15  ;;  %s1380_s29 = sadd.s32 4294967295, %s1279_s28   ;;  %s1279_s28 = sphi %s1337_s28, %s24_s28   ;;  %s1275_s27 = sphi %s1335_s27, %s1815_s27   ;;  %s1271_s26 = sphi %s1333_s26, %s1822_s26   ;;  %s1267_s25 = sphi %s1331_s25, %s1813_s25   ;;  %s1263_s24 = sphi %s1329_s24, %s1821_s24   ;;  %s1259_s23 = sphi %s1327_s23, %s1812_s23   ;;  %s1255_s22 = sphi %s1325_s22, %s1820_s22   ;;  %s1251_s21 = sphi %s1323_s21, %s1819_s21   ;;  %s1247_s20 = sphi %s1321_s20, %s1818_s20   ;;  %s1243_s19 = sphi %s1319_s19, %s1817_s19   ;;  %s1239_s18 = sphi %s1317_s18, %s1816_s18   ;;  %s1235_s17 = sphi %s1315_s17, %s1809_s17   ;;  %s1231_s16 = sphi %s1313_s16, %s1808_s16   ;;  %s1227_s15 = sphi %s1311_s15, %s1807_s15  }
  0x12   : > { %1771 = sst [smem:[#allocation18_spill]] %s1231_s16  ;;  %s822_s30 = sadd.s32 4294967294, %s1279_s28  }
  0x13   : > { %1772 = sst [smem:[#allocation19_spill]] %s1235_s17  ;;  %p59_p0 = scmp.eq.s32.totalorder %s1380_s29, 0 }
  0x14   : > { %1773 = sst [smem:[#allocation20_spill]] %s1259_s23  ;;  %p84_p1 = scmp.ne.s32.totalorder %s1243_s19, %s1239_s18 }
  0x15   : > { %1774 = sst [smem:[#allocation21_spill]] %s1263_s24  ;;  %p149_p2 = scmp.ne.s32.totalorder %s1235_s17, %s1231_s16 }
  0x16   : > { %1775 = sst [smem:[#allocation22_spill]] %s1267_s25  ;;  %p1390_p3 = por %p84_p1, %p59_p0 }
  0x17   : > { %1776 = sst [smem:[#allocation23_spill]] %s1275_s27  ;;  %p150_p4 = scmp.eq.s32.totalorder %s1380_s29, 3 }
  0x18   : > { %p155_p5 = scmp.ne.s32.totalorder %s1231_s16, %s1227_s15  ;;  %p156_p6 = scmp.eq.s32.totalorder %s822_s30, 3 }
  0x19   : > { %p1397_p7 = por %p150_p4, %p149_p2  ;;  %p823_p8 = scmp.ge.s32.totalorder %s1279_s28, 1 }
  0x1a   : > { %p1402_p9 = por %p156_p6, %p155_p5  ;;  %p163_p10 = scmp.lt.s32.totalorder %s1279_s28, 5 }
  0x1b   : > { %s1778_s7 = scalar_select %p1397_p7, 1, 0 }
  0x1c   : > { %s1780_s8 = scalar_select %p1402_p9, 1, 0 }
  0x1d   : > { %1779 = sst [smem:[#allocation24_spill]] %s1778_s7  ;;  %p1410_p11 = pnand %p823_p8, %p163_p10 }
  0x1e   : > { %1781 = sst [smem:[#allocation25_spill]] %s1780_s8  ;;  %s1281_s13 = smov [#allocation8]  }
  0x1f   : > { %s1782_s2 = sld [smem:[#allocation31_spill]]  ;;  %p860_p12 = pneg %p1410_p11 }
  0x20   : > { %s177_s14 = sshll.u32 %s1281_s13, 4  ;;  %s1784_s3 = sld [smem:[#allocation32_spill]]  ;;  %s178_s14 = int_to_ptr.vmem [resolvable:$true] %s177_s14 }
  0x21   : > { %p861_p13 = pnand %p860_p12, %p59_p0  ;;  %s1282_s10 = smov [#allocation9]  }
  0x22   : > { %s189_s5 = sshll.u32 %s1282_s10, 4  ;;  %s33_s13 = sadd.s32 1, %s1271_s26  ;;  %s190_s5 = int_to_ptr.vmem [resolvable:$true] %s189_s5 }
  0x23   : > { %s36_s18 = sadd.s32 1, %s1275_s27  ;;  %p34_p1 = scmp.ge.s32.totalorder %s33_s13, 2 }
  0x24   : > { %s45_s30 = sadd.s32 1, %s1259_s23  ;;  %p52_p2 = scmp.ne.s32.totalorder %s1259_s23, %s1255_s22 }
  0x25   : > { %s175_s11 = sshll.u32 %s1782_s2, 4  ;;  %p53_p4 = scmp.eq.s32.totalorder %s1279_s28, 0  ;;  %s176_s11 = int_to_ptr.hbm [resolvable:$true] %s175_s11 }
  0x26   : > { %s187_s9 = sshll.u32 %s1784_s3, 4  ;;  %s1824_s13 = smov (%p34_p1, %s33_s13), 0  ;;  %s188_s9 = int_to_ptr.hbm [resolvable:$true] %s187_s9 }
  0x27   : > { %863 = dma.hbm_to_vmem [thread:$0]  (!%p861_p13), %s176_s11, 128, %s178_s14, [#allocation7]  }
  0x28   : > { %866 = dma.hbm_to_vmem [thread:$0]  (!%p861_p13), %s188_s9, 128, %s190_s5, [#allocation10]  }
  0x29   : > { %1785 = sst [smem:[#allocation26_spill]] %s1824_s13  ;;  %s1826_s18 = smov (!%p34_p1, %s36_s18), %s1275_s27 }
  0x2a   : > { %s41_s11 = ssub.s32 %s1271_s26, %s1824_s13  ;;  %p1434_p5 = por %p53_p4, %p52_p2 }
  0x2b   : > { %p38_p6 = scmp.ge.s32.totalorder %s1826_s18, 2  ;;  %p58_p8 = scmp.ne.s32.totalorder %s1255_s22, %s1251_s21 }
  0x2c   : > { %p69_p10 = scmp.eq.s32.totalorder %s41_s11, 0  ;;  %s71_s14 = sadd.s32 1, %s1247_s20 }
  0x2d   : > { %s1828_s18 = smov (%p38_p6, %s1826_s18), 0  ;;  %p1445_p12 = por %p59_p0, %p58_p8 }
  0x2e   : > { %1787 = sst [smem:[#allocation27_spill]] %s1828_s18  ;;  %p78_p13 = scmp.ne.s32.totalorder %s1247_s20, %s1243_s19 }
  0x2f   : > { %s40_s10 = ssub.s32 %s1275_s27, %s1828_s18  ;;  %p880_p1 = scmp.lt.s32.totalorder %s1279_s28, 4 }
  0x30   : > { %s42_s2 = sor.u32 %s41_s11, %s40_s10  ;;  %p80_p2 = por %p78_p13, %p53_p4 }
  0x31   : > { %p43_p9 = scmp.eq.s32.totalorder %s42_s2, 0  ;;  %p137_p7 = scmp.eq.s32.totalorder %s40_s10, 0 }
  0x32   : > { %s1457_s21 = scalar_select %p69_p10, %s1247_s20, %s71_s14  }
  0x33   : > { %s1460_s3 = scalar_select %p43_p9, %s1259_s23, %s45_s30  }
  0x34   : > { %1789 = sst [smem:[#allocation28_spill]] %s1457_s21  ;;  %s1791_s13 = sadd.s32 1, %s1235_s17 }
  0x35   : > { %1790 = sst [smem:[#allocation29_spill]] %s1460_s3  ;;  %s200_s15 = sand.u32 1, %s1259_s23  }
  0x36   : > { %s1465_s8 = scalar_select %p137_p7, %s1235_s17, %s1791_s13  }
  0x37   : > { %s205_s4 = smul.u32 9, %s1271_s26  ;;  %p868_p6 = pnand %p880_p1, %p1434_p5 }
  0x38   : > { %1792 = sst [smem:[#allocation30_spill]] %s1465_s8  ;;  %s841_s7 = smul.u32 72, %s200_s15 }
  0x39   : > { %s842_s25 = smul.u32 18, %s1275_s27  ;;  %p1476_p4 = pnand %p880_p1, %p80_p2 }
  0x3a   : > { %s204_s11 = scalar_lea.vmem [#allocation3], %s841_s7  ;;  %s222_s5 = sand.u32 1, %s1279_s28  }
  0x3b   : > { %s209_s30 = sadd.s32 %s842_s25, %s205_s4  ;;  %s215_s14 = sshll.u32 %s204_s11, 4  ;;  %s216_s14 = int_to_ptr.vmem [resolvable:$true] %s215_s14 }
  0x3c   : > { %s827_s10 = sshll.u32 %s209_s30, 3  ;;  %s201_s27 = scalar_lea.sflag [#allocation4], %s200_s15 }
  0x3d   : > { %s211_s3 = scalar_lea.hbm %s1749_s0, %s827_s10  ;;  %s224_s21 = sand.u32 1, %s1247_s20  }
  0x3e   : > { %s213_s23 = sshll.u32 %s211_s3, 4  ;;  %s843_s8 = smul.u32 1152, %s224_s21  ;;  %s214_s23 = int_to_ptr.hbm [resolvable:$true] %s213_s23 }
  0x3f   : > { %870 = dma.hbm_to_vmem [thread:$0]  (!%p868_p6), %s214_s23, 1152, %s216_s14, %s201_s27  }
  0x40   : > { %s840_s17 = smul.u32 1152, %s1271_s26  ;;  %s226_s25 = scalar_lea.vmem [#allocation6], %s843_s8 }
  0x41   : > { %s234_s7 = sshll.u32 %s226_s25, 4  ;;  %s223_s18 = scalar_lea.sflag [#allocation7], %s222_s5  ;;  %s235_s7 = int_to_ptr.vmem [resolvable:$true] %s234_s7 }
  0x42   : > { %s231_s4 = scalar_lea.hbm %s1750_s1, %s840_s17  ;;  %s1283_s11 = smov 128  }
  0x43   : > { %s232_s30 = sshll.u32 %s231_s4, 4  ;;  %s1284_s3 = smov 8   ;;  %s233_s30 = int_to_ptr.hbm [resolvable:$true] %s232_s30 }
  0x44   : > { %873 = dma.hbm_to_vmem [thread:$0]  (!%p1476_p4), %s233_s30, 18432, %s235_s7, %s223_s18, %s1283_s11, %s1283_s11, %s1284_s3  }
  0x45   : > { %246 = sbr.rel (%p1410_p11) target bundleno = 486 (0x1e6), region = 36  ;;  %s248_s15 = sand.u32 (!%p1410_p11), 1, %s1255_s22  }
  0x46   : > { %s844_s23 = smul.u32 (!%p1410_p11), 72, %s248_s15  ;;  %s249_s27 = scalar_lea.sflag (!%p1410_p11), [#allocation4], %s248_s15 }
  0x48   : > { %s1494_s16 = scalar_lea.vmem (!%p1410_p11), [#allocation3], %s844_s23 }
  0x4a   : > { %1206 = dma.done.wait (%p1445_p12), %s249_s27, 1152  }
  0x4b   : > { %1208 = vsyncadd (%p1445_p12), %s249_s27, 4294966144  ;;  %s258_s17 = sand.u32 1, %s1380_s29   ;;  %s260_s24 = sand.u32 1, %s1243_s19  }
  0x4c   : > { %s845_s8 = smul.u32 1152, %s260_s24  ;;  %s259_s12 = scalar_lea.sflag [#allocation7], %s258_s17 }
  0x4e   : > { %s1502_s21 = scalar_lea.vmem [#allocation6], %s845_s8 }
  0x4f   : > { %1210 = dma.done.wait (%p1390_p3), %s259_s12, 18432  }
  0x50   : > { %1212 = vsyncadd (%p1390_p3), %s259_s12, 4294948864 }
  0x51   : > { %1214 = dma.done.wait (%p59_p0), [#allocation7], 128  }
  0x52   : > { %1216 = vsyncadd (%p59_p0), [#allocation7], 4294967168 }
  0x53   : > { %1218 = dma.done.wait (%p59_p0), [#allocation10], 128  }
  0x54   : > { %1220 = vsyncadd (%p59_p0), [#allocation10], 4294967168  ;;  %s1794_s9 = sld [smem:[#allocation18_spill]] }
  0x55   : > { %s1795_s10 = sld [smem:[#allocation21_spill]] }
  0x5a   : > { %s300_s2 = sand.u32 1, %s1794_s9  }
  0x5b   : > { %s1519_s14 = sshll.u32 %s300_s2, 3  ;;  %p833_p3 = scmp.ne.s32.totalorder %s1795_s10, 0 }
  0x5c   : > { %s302_s6 = scalar_lea.vmem [#allocation11], %s1519_s14 }
  0x5d   : > { %308 = sbr.rel (%p833_p3) target bundleno = 100 (0x64), region = 56 }
  0x62   : > { %v1285_v0 = vmov 0.0  }
  0x63   : > { %309 = vst [vmem:[#allocation2] sm:$0xff] %v1285_v0 }
  0x64 PF: > { %v335_v1 = vld [vmem:[%s1502_s21 + $0x78] sm:$0xff]  ;;  %v334_v2 = vld [vmem:[%s1502_s21 + $0x70] sm:$0xff]  ;;  %v333_v5 = vld [vmem:[%s1502_s21 + $0x68] sm:$0xff]  ;;  %s1796_s29 = sld [smem:[#allocation21_spill]] }
  0x65   : > { %464 = vmatpush.msra.mxu0 %v335_v1  ;;  %v367_v3 = vld [vmem:[%s1502_s21 + $0x178] sm:$0xff]  ;;  %v366_v4 = vld [vmem:[%s1502_s21 + $0x170] sm:$0xff]  ;;  %v365_v8 = vld [vmem:[%s1502_s21 + $0x168] sm:$0xff] }
  0x66   : > { %504 = vmatpush.msra.mxu2 %v367_v3  ;;  %v383_v6 = vld [vmem:[%s1502_s21 + $0x1f8] sm:$0xff]  ;;  %v382_v9 = vld [vmem:[%s1502_s21 + $0x1f0] sm:$0xff]  ;;  %v332_v10 = vld [vmem:[%s1502_s21 + $0x60] sm:$0xff] }
  0x67   : > { %v351_v7 = vld [vmem:[%s1502_s21 + $0xf8] sm:$0xff]  ;;  %465 = vmatpush.msra.mxu0 %v334_v2  ;;  %524 = vmatpush.msra.mxu3 %v383_v6  ;;  %v350_v11 = vld [vmem:[%s1502_s21 + $0xf0] sm:$0xff]  ;;  %v381_v12 = vld [vmem:[%s1502_s21 + $0x1e8] sm:$0xff] }
  0x68   : > { %505 = vmatpush.msra.mxu2 %v366_v4  ;;  %484 = vmatpush.msra.mxu1 %v351_v7  ;;  %v364_v13 = vld [vmem:[%s1502_s21 + $0x160] sm:$0xff]  ;;  %v349_v14 = vld [vmem:[%s1502_s21 + $0xe8] sm:$0xff]  ;;  %v331_v15 = vld [vmem:[%s1502_s21 + $0x58] sm:$0xff] }
  0x69   : > { %466 = vmatpush.msra.mxu0 %v333_v5  ;;  %525 = vmatpush.msra.mxu3 %v382_v9  ;;  %v380_v16 = vld [vmem:[%s1502_s21 + $0x1e0] sm:$0xff]  ;;  %v363_v17 = vld [vmem:[%s1502_s21 + $0x158] sm:$0xff]  ;;  %v330_v19 = vld [vmem:[%s1502_s21 + $0x50] sm:$0xff] }
  0x6a   : > { %506 = vmatpush.msra.mxu2 %v365_v8  ;;  %485 = vmatpush.msra.mxu1 %v350_v11  ;;  %v348_v18 = vld [vmem:[%s1502_s21 + $0xe0] sm:$0xff]  ;;  %v379_v20 = vld [vmem:[%s1502_s21 + $0x1d8] sm:$0xff]  ;;  %v362_v21 = vld [vmem:[%s1502_s21 + $0x150] sm:$0xff]  ;;  %p834_p0 = scmp.ne.s32.totalorder %s1796_s29, 1 }
  0x6b   : > { %467 = vmatpush.msra.mxu0 %v332_v10  ;;  %526 = vmatpush.msra.mxu3 %v381_v12  ;;  %v347_v22 = vld [vmem:[%s1502_s21 + $0xd8] sm:$0xff]  ;;  %v329_v23 = vld [vmem:[%s1502_s21 + $0x48] sm:$0xff]  ;;  %v378_v24 = vld [vmem:[%s1502_s21 + $0x1d0] sm:$0xff] }
  0x6c   : > { %507 = vmatpush.msra.mxu2 %v364_v13  ;;  %486 = vmatpush.msra.mxu1 %v349_v14  ;;  %v361_v25 = vld [vmem:[%s1502_s21 + $0x148] sm:$0xff]  ;;  %v346_v26 = vld [vmem:[%s1502_s21 + $0xd0] sm:$0xff]  ;;  %v328_v27 = vld [vmem:[%s1502_s21 + $0x40] sm:$0xff] }
  0x6d   : > { %468 = vmatpush.msra.mxu0 %v331_v15  ;;  %527 = vmatpush.msra.mxu3 %v380_v16  ;;  %v377_v28 = vld [vmem:[%s1502_s21 + $0x1c8] sm:$0xff]  ;;  %v360_v29 = vld [vmem:[%s1502_s21 + $0x140] sm:$0xff]  ;;  %v327_v31 = vld [vmem:[%s1502_s21 + $0x38] sm:$0xff] }
  0x6e   : > { %508 = vmatpush.msra.mxu2 %v363_v17  ;;  %487 = vmatpush.msra.mxu1 %v348_v18  ;;  %v345_v30 = vld [vmem:[%s1502_s21 + $0xc8] sm:$0xff]  ;;  %v376_v32 = vld [vmem:[%s1502_s21 + $0x1c0] sm:$0xff]  ;;  %v359_v33 = vld [vmem:[%s1502_s21 + $0x138] sm:$0xff] }
  0x6f   : > { %469 = vmatpush.msra.mxu0 %v330_v19  ;;  %528 = vmatpush.msra.mxu3 %v379_v20  ;;  %v344_v34 = vld [vmem:[%s1502_s21 + $0xc0] sm:$0xff]  ;;  %v326_v35 = vld [vmem:[%s1502_s21 + $0x30] sm:$0xff]  ;;  %v375_v36 = vld [vmem:[%s1502_s21 + $0x1b8] sm:$0xff] }
  0x70   : > { %509 = vmatpush.msra.mxu2 %v362_v21  ;;  %488 = vmatpush.msra.mxu1 %v347_v22  ;;  %v358_v37 = vld [vmem:[%s1502_s21 + $0x130] sm:$0xff]  ;;  %v343_v38 = vld [vmem:[%s1502_s21 + $0xb8] sm:$0xff]  ;;  %v325_v39 = vld [vmem:[%s1502_s21 + $0x28] sm:$0xff] }
  0x71   : > { %470 = vmatpush.msra.mxu0 %v329_v23  ;;  %529 = vmatpush.msra.mxu3 %v378_v24  ;;  %v374_v40 = vld [vmem:[%s1502_s21 + $0x1b0] sm:$0xff]  ;;  %v357_v41 = vld [vmem:[%s1502_s21 + $0x128] sm:$0xff]  ;;  %v324_v43 = vld [vmem:[%s1502_s21 + $0x20] sm:$0xff] }
  0x72   : > { %510 = vmatpush.msra.mxu2 %v361_v25  ;;  %489 = vmatpush.msra.mxu1 %v346_v26  ;;  %v342_v42 = vld [vmem:[%s1502_s21 + $0xb0] sm:$0xff]  ;;  %v373_v44 = vld [vmem:[%s1502_s21 + $0x1a8] sm:$0xff]  ;;  %v356_v45 = vld [vmem:[%s1502_s21 + $0x120] sm:$0xff] }
  0x73   : > { %471 = vmatpush.msra.mxu0 %v328_v27  ;;  %530 = vmatpush.msra.mxu3 %v377_v28  ;;  %v341_v46 = vld [vmem:[%s1502_s21 + $0xa8] sm:$0xff]  ;;  %v323_v47 = vld [vmem:[%s1502_s21 + $0x18] sm:$0xff]  ;;  %v372_v48 = vld [vmem:[%s1502_s21 + $0x1a0] sm:$0xff] }
  0x74   : > { %511 = vmatpush.msra.mxu2 %v360_v29  ;;  %490 = vmatpush.msra.mxu1 %v345_v30  ;;  %v355_v49 = vld [vmem:[%s1502_s21 + $0x118] sm:$0xff]  ;;  %v340_v50 = vld [vmem:[%s1502_s21 + $0xa0] sm:$0xff]  ;;  %v322_v51 = vld [vmem:[%s1502_s21 + $0x10] sm:$0xff] }
  0x75   : > { %472 = vmatpush.msra.mxu0 %v327_v31  ;;  %531 = vmatpush.msra.mxu3 %v376_v32  ;;  %v371_v52 = vld [vmem:[%s1502_s21 + $0x198] sm:$0xff]  ;;  %v354_v53 = vld [vmem:[%s1502_s21 + $0x110] sm:$0xff]  ;;  %v321_v55 = vld [vmem:[%s1502_s21 + $0x8] sm:$0xff] }
  0x76   : > { %512 = vmatpush.msra.mxu2 %v359_v33  ;;  %491 = vmatpush.msra.mxu1 %v344_v34  ;;  %v339_v54 = vld [vmem:[%s1502_s21 + $0x98] sm:$0xff]  ;;  %v370_v56 = vld [vmem:[%s1502_s21 + $0x190] sm:$0xff]  ;;  %v353_v57 = vld [vmem:[%s1502_s21 + $0x108] sm:$0xff] }
  0x77   : > { %473 = vmatpush.msra.mxu0 %v326_v35  ;;  %532 = vmatpush.msra.mxu3 %v375_v36  ;;  %v338_v58 = vld [vmem:[%s1502_s21 + $0x90] sm:$0xff]  ;;  %v320_v59 = vld [vmem:[%s1502_s21] sm:$0xff]  ;;  %v369_v60 = vld [vmem:[%s1502_s21 + $0x188] sm:$0xff] }
  0x78   : > { %513 = vmatpush.msra.mxu2 %v358_v37  ;;  %492 = vmatpush.msra.mxu1 %v343_v38  ;;  %v399_v61 = vld [vmem:[%s1502_s21 + $0x278] sm:$0xff]  ;;  %v352_v62 = vld [vmem:[%s1502_s21 + $0x100] sm:$0xff]  ;;  %v337_v0 = vld [vmem:[%s1502_s21 + $0x88] sm:$0xff] }
  0x79   : > { %474 = vmatpush.msra.mxu0 %v325_v39  ;;  %533 = vmatpush.msra.mxu3 %v374_v40  ;;  %v431_v63 = vld [vmem:[%s1502_s21 + $0x378] sm:$0xff]  ;;  %v398_v1 = vld [vmem:[%s1502_s21 + $0x270] sm:$0xff]  ;;  %v368_v2 = vld [vmem:[%s1502_s21 + $0x180] sm:$0xff] }
  0x7a   : > { %514 = vmatpush.msra.mxu2 %v357_v41  ;;  %493 = vmatpush.msra.mxu1 %v342_v42  ;;  %v430_v3 = vld [vmem:[%s1502_s21 + $0x370] sm:$0xff]  ;;  %v447_v4 = vld [vmem:[%s1502_s21 + $0x3f8] sm:$0xff]  ;;  %v397_v5 = vld [vmem:[%s1502_s21 + $0x268] sm:$0xff] }
  0x7b   : > { %475 = vmatpush.msra.mxu0 %v324_v43  ;;  %534 = vmatpush.msra.mxu3 %v373_v44  ;;  %v336_v6 = vld [vmem:[%s1502_s21 + $0x80] sm:$0xff]  ;;  %v415_v7 = vld [vmem:[%s1502_s21 + $0x2f8] sm:$0xff]  ;;  %v429_v8 = vld [vmem:[%s1502_s21 + $0x368] sm:$0xff] }
  0x7c   : > { %515 = vmatpush.msra.mxu2 %v356_v45  ;;  %494 = vmatpush.msra.mxu1 %v341_v46  ;;  %v396_v9 = vld [vmem:[%s1502_s21 + $0x260] sm:$0xff]  ;;  %v446_v10 = vld [vmem:[%s1502_s21 + $0x3f0] sm:$0xff]  ;;  %v395_v13 = vld [vmem:[%s1502_s21 + $0x258] sm:$0xff] }
  0x7d   : > { %476 = vmatpush.msra.mxu0 %v323_v47  ;;  %535 = vmatpush.msra.mxu3 %v372_v48  ;;  %v414_v11 = vld [vmem:[%s1502_s21 + $0x2f0] sm:$0xff]  ;;  %v428_v12 = vld [vmem:[%s1502_s21 + $0x360] sm:$0xff]  ;;  %v445_v14 = vld [vmem:[%s1502_s21 + $0x3e8] sm:$0xff] }
  0x7e   : > { %516 = vmatpush.msra.mxu2 %v355_v49  ;;  %495 = vmatpush.msra.mxu1 %v340_v50  ;;  %v413_v15 = vld [vmem:[%s1502_s21 + $0x2e8] sm:$0xff]  ;;  %v427_v16 = vld [vmem:[%s1502_s21 + $0x358] sm:$0xff]  ;;  %v394_v17 = vld [vmem:[%s1502_s21 + $0x250] sm:$0xff] }
  0x7f   : > { %477 = vmatpush.msra.mxu0 %v322_v51  ;;  %536 = vmatpush.msra.mxu3 %v371_v52  ;;  %v444_v18 = vld [vmem:[%s1502_s21 + $0x3e0] sm:$0xff]  ;;  %v426_v20 = vld [vmem:[%s1502_s21 + $0x350] sm:$0xff]  ;;  %v393_v21 = vld [vmem:[%s1502_s21 + $0x248] sm:$0xff] }
  0x80   : > { %517 = vmatpush.msra.mxu2 %v354_v53  ;;  %496 = vmatpush.msra.mxu1 %v339_v54  ;;  %v412_v19 = vld [vmem:[%s1502_s21 + $0x2e0] sm:$0xff]  ;;  %v443_v22 = vld [vmem:[%s1502_s21 + $0x3d8] sm:$0xff]  ;;  %v425_v24 = vld [vmem:[%s1502_s21 + $0x348] sm:$0xff] }
  0x81   : > { %478 = vmatpush.msra.mxu0 %v321_v55  ;;  %537 = vmatpush.msra.mxu3 %v370_v56  ;;  %v411_v23 = vld [vmem:[%s1502_s21 + $0x2d8] sm:$0xff]  ;;  %v392_v25 = vld [vmem:[%s1502_s21 + $0x240] sm:$0xff]  ;;  %v442_v26 = vld [vmem:[%s1502_s21 + $0x3d0] sm:$0xff] }
  0x82   : > { %518 = vmatpush.msra.mxu2 %v353_v57  ;;  %497 = vmatpush.msra.mxu1 %v338_v58  ;;  %v410_v27 = vld [vmem:[%s1502_s21 + $0x2d0] sm:$0xff]  ;;  %v424_v28 = vld [vmem:[%s1502_s21 + $0x340] sm:$0xff]  ;;  %v391_v29 = vld [vmem:[%s1502_s21 + $0x238] sm:$0xff] }
  0x83   : > { %479 = vmatpush.msra.mxu0 %v320_v59  ;;  %538 = vmatpush.msra.mxu3 %v369_v60  ;;  %v441_v30 = vld [vmem:[%s1502_s21 + $0x3c8] sm:$0xff]  ;;  %v423_v32 = vld [vmem:[%s1502_s21 + $0x338] sm:$0xff]  ;;  %v390_v33 = vld [vmem:[%s1502_s21 + $0x230] sm:$0xff] }
  0x84   : > { %519 = vmatpush.msra.mxu2 %v352_v62  ;;  %498 = vmatpush.msra.mxu1 %v337_v0  ;;  %v409_v31 = vld [vmem:[%s1502_s21 + $0x2c8] sm:$0xff]  ;;  %v440_v34 = vld [vmem:[%s1502_s21 + $0x3c0] sm:$0xff]  ;;  %v422_v36 = vld [vmem:[%s1502_s21 + $0x330] sm:$0xff] }
  0x85   : > { %544 = vmatpush.msrb.mxu0 %v399_v61  ;;  %539 = vmatpush.msra.mxu3 %v368_v2  ;;  %v408_v35 = vld [vmem:[%s1502_s21 + $0x2c0] sm:$0xff]  ;;  %v389_v37 = vld [vmem:[%s1502_s21 + $0x228] sm:$0xff]  ;;  %v439_v38 = vld [vmem:[%s1502_s21 + $0x3b8] sm:$0xff] }
  0x86   : > { %584 = vmatpush.msrb.mxu2 %v431_v63  ;;  %499 = vmatpush.msra.mxu1 %v336_v6  ;;  %v407_v39 = vld [vmem:[%s1502_s21 + $0x2b8] sm:$0xff]  ;;  %v421_v40 = vld [vmem:[%s1502_s21 + $0x328] sm:$0xff]  ;;  %v388_v41 = vld [vmem:[%s1502_s21 + $0x220] sm:$0xff] }
  0x87   : > { %545 = vmatpush.msrb.mxu0 %v398_v1  ;;  %604 = vmatpush.msrb.mxu3 %v447_v4  ;;  %v438_v42 = vld [vmem:[%s1502_s21 + $0x3b0] sm:$0xff]  ;;  %v420_v44 = vld [vmem:[%s1502_s21 + $0x320] sm:$0xff]  ;;  %v387_v45 = vld [vmem:[%s1502_s21 + $0x218] sm:$0xff] }
  0x88   : > { %585 = vmatpush.msrb.mxu2 %v430_v3  ;;  %564 = vmatpush.msrb.mxu1 %v415_v7  ;;  %v406_v43 = vld [vmem:[%s1502_s21 + $0x2b0] sm:$0xff]  ;;  %v437_v46 = vld [vmem:[%s1502_s21 + $0x3a8] sm:$0xff]  ;;  %v419_v50 = vld [vmem:[%s1502_s21 + $0x318] sm:$0xff] }
  0x89   : > { %546 = vmatpush.msrb.mxu0 %v397_v5  ;;  %605 = vmatpush.msrb.mxu3 %v446_v10  ;;  %v313_v47 = vld [vmem:[%s1494_s16 + $0x10] sm:$0xff]  ;;  %v386_v49 = vld [vmem:[%s1502_s21 + $0x210] sm:$0xff]  ;;  %v435_v58 = vld [vmem:[%s1502_s21 + $0x398] sm:$0xff] }
  0x8a   : > { %586 = vmatpush.msrb.mxu2 %v429_v8  ;;  %565 = vmatpush.msrb.mxu1 %v414_v11  ;;  %v405_v48 = vld [vmem:[%s1502_s21 + $0x2a8] sm:$0xff]  ;;  %v436_v51 = vld [vmem:[%s1502_s21 + $0x3a0] sm:$0xff]  ;;  %v311_v52 = vld [vmem:[%s1494_s16] sm:$0xff] }
  0x8b   : > { %547 = vmatpush.msrb.mxu0 %v396_v9  ;;  %606 = vmatpush.msrb.mxu3 %v445_v14  ;;  %v385_v53 = vld [vmem:[%s1502_s21 + $0x208] sm:$0xff]  ;;  %v404_v55 = vld [vmem:[%s1502_s21 + $0x2a0] sm:$0xff]  ;;  %v418_v56 = vld [vmem:[%s1502_s21 + $0x310] sm:$0xff] }
  0x8c   : > { %587 = vmatpush.msrb.mxu2 %v428_v12  ;;  %566 = vmatpush.msrb.mxu1 %v413_v15  ;;  %v314_v54 = vld [vmem:[%s1494_s16 + $0x18] sm:$0xff]  ;;  %v384_v57 = vld [vmem:[%s1502_s21 + $0x200] sm:$0xff]  ;;  %v463_v60 = vld [vmem:[%s1502_s21 + $0x478] sm:$0xff] }
  0x8d   : > { %548 = vmatpush.msrb.mxu0 %v395_v13  ;;  %607 = vmatpush.msrb.mxu3 %v444_v18  ;;  %v312_v59 = vld [vmem:[%s1494_s16 + $0x8] sm:$0xff]  ;;  %v417_v62 = vld [vmem:[%s1502_s21 + $0x308] sm:$0xff]  ;;  %v434_v63 = vld [vmem:[%s1502_s21 + $0x390] sm:$0xff] }
  0x8e   : > { %588 = vmatpush.msrb.mxu2 %v427_v16  ;;  %567 = vmatpush.msrb.mxu1 %v412_v19  ;;  %v403_v61 = vld [vmem:[%s1502_s21 + $0x298] sm:$0xff]  ;;  %v462_v0 = vld [vmem:[%s1502_s21 + $0x470] sm:$0xff]  ;;  %v416_v2 = vld [vmem:[%s1502_s21 + $0x300] sm:$0xff] }
  0x8f   : > { %549 = vmatpush.msrb.mxu0 %v394_v17  ;;  %608 = vmatpush.msrb.mxu3 %v443_v22  ;;  %v402_v1 = vld [vmem:[%s1502_s21 + $0x290] sm:$0xff]  ;;  %v433_v3 = vld [vmem:[%s1502_s21 + $0x388] sm:$0xff]  ;;  %v432_v7 = vld [vmem:[%s1502_s21 + $0x380] sm:$0xff] }
  0x90   : > { %589 = vmatpush.msrb.mxu2 %v426_v20  ;;  %568 = vmatpush.msrb.mxu1 %v411_v23  ;;  %v317_v4 = vld [vmem:[%s1494_s16 + $0x30] sm:$0xff]  ;;  %v315_v8 = vld [vmem:[%s1494_s16 + $0x20] sm:$0xff]  ;;  %v318_v9 = vld [vmem:[%s1494_s16 + $0x38] sm:$0xff] }
  0x91   : > { %550 = vmatpush.msrb.mxu0 %v393_v21  ;;  %609 = vmatpush.msrb.mxu3 %v442_v26  ;;  %v461_v5 = vld [vmem:[%s1502_s21 + $0x468] sm:$0xff]  ;;  %v460_v10 = vld [vmem:[%s1502_s21 + $0x460] sm:$0xff]  ;;  %v459_v13 = vld [vmem:[%s1502_s21 + $0x458] sm:$0xff] }
  0x92   : > { %590 = vmatpush.msrb.mxu2 %v425_v24  ;;  %569 = vmatpush.msrb.mxu1 %v410_v27  ;;  %v401_v6 = vld [vmem:[%s1502_s21 + $0x288] sm:$0xff]  ;;  %v400_v11 = vld [vmem:[%s1502_s21 + $0x280] sm:$0xff]  ;;  %v458_v14 = vld [vmem:[%s1502_s21 + $0x450] sm:$0xff] }
  0x93   : > { %551 = vmatpush.msrb.mxu0 %v392_v25  ;;  %610 = vmatpush.msrb.mxu3 %v441_v30  ;;  %v316_v12 = vld [vmem:[%s1494_s16 + $0x28] sm:$0xff]  ;;  %v457_v15 = vld [vmem:[%s1502_s21 + $0x448] sm:$0xff]  ;;  %v454_v18 = vld [vmem:[%s1502_s21 + $0x430] sm:$0xff] }
  0x94   : > { %591 = vmatpush.msrb.mxu2 %v424_v28  ;;  %570 = vmatpush.msrb.mxu1 %v409_v31  ;;  %v456_v16 = vld [vmem:[%s1502_s21 + $0x440] sm:$0xff]  ;;  %v455_v17 = vld [vmem:[%s1502_s21 + $0x438] sm:$0xff]  ;;  %v453_v19 = vld [vmem:[%s1502_s21 + $0x428] sm:$0xff] }
  0x95   : > { %552 = vmatpush.msrb.mxu0 %v391_v29  ;;  %611 = vmatpush.msrb.mxu3 %v440_v34  ;;  %v452_v20 = vld [vmem:[%s1502_s21 + $0x420] sm:$0xff]  ;;  %v451_v21 = vld [vmem:[%s1502_s21 + $0x418] sm:$0xff]  ;;  %v450_v22 = vld [vmem:[%s1502_s21 + $0x410] sm:$0xff] }
  0x96   : > { %592 = vmatpush.msrb.mxu2 %v423_v32  ;;  %571 = vmatpush.msrb.mxu1 %v408_v35  ;;  %v449_v23 = vld [vmem:[%s1502_s21 + $0x408] sm:$0xff]  ;;  %v448_v24 = vld [vmem:[%s1502_s21 + $0x400] sm:$0xff]  ;;  %v319_v25 = vld [vmem:[%s1494_s16 + $0x40] sm:$0xff] }
  0x97   : > { %553 = vmatpush.msrb.mxu0 %v390_v33  ;;  %612 = vmatpush.msrb.mxu3 %v439_v38 }
  0x98   : > { %593 = vmatpush.msrb.mxu2 %v422_v36  ;;  %572 = vmatpush.msrb.mxu1 %v407_v39 }
  0x99   : > { %554 = vmatpush.msrb.mxu0 %v389_v37  ;;  %613 = vmatpush.msrb.mxu3 %v438_v42 }
  0x9a   : > { %594 = vmatpush.msrb.mxu2 %v421_v40  ;;  %573 = vmatpush.msrb.mxu1 %v406_v43 }
  0x9b   : > { %555 = vmatpush.msrb.mxu0 %v388_v41  ;;  %614 = vmatpush.msrb.mxu3 %v437_v46  ;;  %v310_v41 = vld [vmem:[#allocation2] sm:$0xff] }
  0x9c   : > { %595 = vmatpush.msrb.mxu2 %v420_v44  ;;  %574 = vmatpush.msrb.mxu1 %v405_v48 }
  0x9d   : > { %556 = vmatpush.msrb.mxu0 %v387_v45  ;;  %520 = vmatmul.f32.vlgmr.msra.gmra.mxu2 %v313_v47 }
  0x9e   : > { %596 = vmatpush.msrb.mxu2 %v419_v50  ;;  %615 = vmatpush.msrb.mxu3 %v436_v51 }
  0x9f   : > { %557 = vmatpush.msrb.mxu0 %v386_v49  ;;  %540 = vmatmul.f32.vlgmr.msra.gmra.mxu3 %v314_v54 }
  0xa0   : > { %480 = vmatmul.f32.vlgmr.msra.gmra.mxu0 %v311_v52  ;;  %575 = vmatpush.msrb.mxu1 %v404_v55 }
  0xa1   : > { %558 = vmatpush.msrb.mxu0 %v385_v53  ;;  %597 = vmatpush.msrb.mxu2 %v418_v56 }
  0xa2   : > { %616 = vmatpush.msrb.mxu3 %v435_v58  ;;  %500 = vmatmul.f32.vlgmr.msra.gmra.mxu1 %v312_v59 }
  0xa3   : > { %559 = vmatpush.msrb.mxu0 %v384_v57  ;;  %576 = vmatpush.msrb.mxu1 %v403_v61 }
  0xa4   : > { %598 = vmatpush.msrb.mxu2 %v417_v62  ;;  %617 = vmatpush.msrb.mxu3 %v434_v63 }
  0xa5   : > { %624 = vmatpush.msra.mxu0 %v463_v60  ;;  %577 = vmatpush.msrb.mxu1 %v402_v1 }
  0xa6   : > { %599 = vmatpush.msrb.mxu2 %v416_v2  ;;  %618 = vmatpush.msrb.mxu3 %v433_v3 }
  0xa7   : > { %625 = vmatpush.msra.mxu0 %v462_v0  ;;  %600 = vmatmul.f32.vlgmr.msrb.gmra.mxu2 %v317_v4 }
  0xa8   : > { %578 = vmatpush.msrb.mxu1 %v401_v6  ;;  %619 = vmatpush.msrb.mxu3 %v432_v7 }
  0xa9   : > { %626 = vmatpush.msra.mxu0 %v461_v5  ;;  %620 = vmatmul.f32.vlgmr.msrb.gmra.mxu3 %v318_v9 }
  0xaa   : > { %560 = vmatmul.f32.vlgmr.msrb.gmra.mxu0 %v315_v8  ;;  %579 = vmatpush.msrb.mxu1 %v400_v11 }
  0xab   : > { %627 = vmatpush.msra.mxu0 %v460_v10  ;;  %580 = vmatmul.f32.vlgmr.msrb.gmra.mxu1 %v316_v12 }
  0xad   : > { %628 = vmatpush.msra.mxu0 %v459_v13 }
  0xaf   : > { %629 = vmatpush.msra.mxu0 %v458_v14 }
  0xb1   : > { %630 = vmatpush.msra.mxu0 %v457_v15 }
  0xb3   : > { %631 = vmatpush.msra.mxu0 %v456_v16 }
  0xb5   : > { %632 = vmatpush.msra.mxu0 %v455_v17 }
  0xb7   : > { %633 = vmatpush.msra.mxu0 %v454_v18 }
  0xb9   : > { %634 = vmatpush.msra.mxu0 %v453_v19 }
  0xbb   : > { %635 = vmatpush.msra.mxu0 %v452_v20 }
  0xbd   : > { %636 = vmatpush.msra.mxu0 %v451_v21 }
  0xbf   : > { %637 = vmatpush.msra.mxu0 %v450_v22 }
  0xc1   : > { %638 = vmatpush.msra.mxu0 %v449_v23 }
  0xc3   : > { %639 = vmatpush.msra.mxu0 %v448_v24 }
  0xc4   : > { %640 = vmatmul.f32.vlgmr.msra.gmra.mxu0 %v319_v25 }
 0x11d   : > { %v481_v27 = vpop.f32.mrf.mxu0 }
 0x11f   : > { %v501_v26 = vpop.f32.mrf.mxu1 }
 0x120   : > { %v502_v28 = vadd.f32 %v501_v26, %v481_v27  ;;  %v521_v29 = vpop.f32.mrf.mxu2 }
 0x122   : > { %v522_v30 = vadd.f32 %v521_v29, %v502_v28  ;;  %v541_v31 = vpop.f32.mrf.mxu3 }
 0x124   : > { %v542_v32 = vadd.f32 %v541_v31, %v522_v30 }
 0x127   : > { %v561_v33 = vpop.f32.mrf.mxu0 }
 0x128   : > { %v562_v34 = vadd.f32 %v561_v33, %v542_v32  ;;  %v581_v35 = vpop.f32.mrf.mxu1 }
 0x12a   : > { %v582_v36 = vadd.f32 %v581_v35, %v562_v34  ;;  %v601_v37 = vpop.f32.mrf.mxu2 }
 0x12c   : > { %v602_v38 = vadd.f32 %v601_v37, %v582_v36  ;;  %v621_v39 = vpop.f32.mrf.mxu3 }
 0x12e   : > { %v622_v40 = vadd.f32 %v621_v39, %v602_v38 }
 0x141   : > { %v641_v42 = vpop.f32.mrf.mxu0 }
 0x142   : > { %v642_v43 = vadd.f32 %v641_v42, %v622_v40  ;;  %649 = sbr.rel (%p834_p0) target bundleno = 464 (0x1d0), region = 60 }
 0x144   : > { %v644_v44 = vadd.f32 %v642_v43, %v310_v41 }
 0x146   : > { %645 = vst [vmem:[#allocation2] sm:$0xff] %v644_v44 }
 0x147   : > { %v650_v46 = vld [vmem:[#allocation8] sm:$0xff]  ;;  %vm652_vm0 = vcmask 64512   ;;  %v676_v47 = vld [vmem:[#allocation9] sm:$0xff] }
 0x14d   : > { %v651_v45 = vld [vmem:[#allocation2] sm:$0xff] }
 0x14e   : > { %671 = vmatpush.msra.mxu0 %v651_v45 }
 0x14f   : > { %835 = vmatmul.msk.f32.vlgmr.msra.gmra.mxu0 %vm652_vm0, %v650_v46 }
 0x1cc   : > { %v673_v48 = vpop.f32.mrf.mxu0 }
 0x1cd   : > { %v677_v49 = vmul.f32 %v676_v47, %v673_v48 }
 0x1cf   : > { %678 = vst [vmem:[%s302_s6] sm:$0xff] %v677_v49 }
 0x1d0 PF: > { %s1797_s13 = sld [smem:[#allocation22_spill]]  ;;  %s692_s15 = sshll.u32 %s302_s6, 4  ;;  %s693_s15 = int_to_ptr.vmem [resolvable:$true] %s692_s15 }
 0x1d1   : > { %s1799_s4 = sld [smem:[#allocation24_spill]]  ;;  %s680_s27 = scalar_lea.sflag [#allocation5], %s300_s2 }
 0x1d2   : > { %s1800_s18 = sld [smem:[#allocation33_spill]] }
 0x1d6   : > { %s837_s25 = sshll.u32 %s1797_s13, 3 }
 0x1d7   : > { %p1802_p9 = scmp.ne.s32.totalorder %s1799_s4, 0 }
 0x1d8   : > { %s1801_s11 = smov %s1800_s18  ;;  %s690_s3 = scalar_lea.hbm %s1800_s18, %s837_s25 }
 0x1d9   : > { %s694_s23 = sshll.u32 %s690_s3, 4  ;;  %s1141_s12 = scalar_lea.hbm %s1801_s11, 16  ;;  %s695_s23 = int_to_ptr.hbm [resolvable:$true] %s694_s23 }
 0x1da   : > { %s1135_s16 = sshra.s32 %s695_s23, 4  ;;  %s1136_s16 = int_to_ptr.hbm [resolvable:$true] %s1135_s16 }
 0x1db   : > { %s1137_s17 = scalar_lea.hbm %s1136_s16, 8  ;;  %p1142_p8 = scmp.lt.s32.totalorder %s1136_s16, %s1801_s11 }
 0x1dc   : > { %p1138_p7 = scmp.ne.s32.totalorder %s1136_s16, %s1137_s17  ;;  %p1143_p10 = scmp.lt.s32.totalorder %s1141_s12, %s1137_s17 }
 0x1de   : > { %p1139_p11 = pnand %p1138_p7, %p1802_p9  ;;  %p1144_p12 = por %p1143_p10, %p1142_p8 }
 0x1e0   : > { %p1140_p5 = pneg %p1139_p11 }
 0x1e2   : > { %p1145_p13 = pnand %p1144_p12, %p1140_p5 }
 0x1e4   : > { %1148 = shalt.err (!%p1145_p13)
}
 0x1e5   : > { %858 = dma.vmem_to_hbm [thread:$0]  (%p1802_p9), %s693_s15, 128, %s695_s23, %s680_s27  }
 0x1e6 PF: > { %s1803_s2 = sld [smem:[#allocation17_spill]]  ;;  %p883_p1 = scmp.ge.s32.totalorder %s1279_s28, 2 }
 0x1e7   : > { %s1804_s14 = sld [smem:[#allocation25_spill]] }
 0x1ec   : > { %s706_s6 = sand.u32 1, %s1803_s2  }
 0x1ed   : > { %p1805_p2 = scmp.ne.s32.totalorder %s1804_s14, 0  ;;  %s707_s10 = scalar_lea.sflag [#allocation5], %s706_s6 }
 0x1ef   : > { %p875_p6 = pnand %p883_p1, %p1805_p2 }
 0x1f1   : > { %p876_p4 = pneg %p875_p6 }
 0x1f3   : > { %1222 = dma.done.wait (%p876_p4), %s707_s10, 128  }
 0x1f4   : > { %1224 = vsyncadd (%p876_p4), %s707_s10, 4294967168  ;;  %s24_s28 = sadd.s32 1, %s1279_s28   ;;  %s1807_s15 = sld [smem:[#allocation18_spill]] }
 0x1f5   : > { %p1702_p3 = scmp.ge.s32.totalorder %s24_s28, 6   ;;  %s1808_s16 = sld [smem:[#allocation19_spill]] }
 0x1f6   : > { %s1809_s17 = sld [smem:[#allocation30_spill]]  ;;  %s1816_s18 = smov %s1243_s19 }
 0x1f7   : > { %s1810_s13 = sld [smem:[#allocation28_spill]]  ;;  %s1817_s19 = smov %s1247_s20 }
 0x1f8   : > { %s1811_s5 = sld [smem:[#allocation20_spill]]  ;;  %s1819_s21 = smov %s1255_s22 }
 0x1f9   : > { %s1812_s23 = sld [smem:[#allocation29_spill]]  ;;  %s1821_s24 = smov %s1271_s26 }
 0x1fa   : > { %s1813_s25 = sld [smem:[#allocation23_spill]] }
 0x1fb   : > { %s1814_s4 = sld [smem:[#allocation26_spill]] }
 0x1fc   : > { %s1815_s27 = sld [smem:[#allocation27_spill]] }
 0x1fd   : > { %s1818_s20 = smov %s1810_s13  ;;  %23 = sbr.rel (!%p1702_p3) target bundleno = 17 (0x11), region = 110 }
 0x1fe   : > { %s1820_s22 = smov %s1811_s5 }
 0x201   : > { %s1822_s26 = smov %s1814_s4 }
 0x202   :  { %713 = vsyncpa [#allocation4], 1 }
 0x203   :  { %715 = vsyncpa [#allocation4 + $0x1], 1 }
 0x204   :  { %716 = vsyncpa [#allocation7], 1 }
 0x205   :  { %718 = vsyncpa [#allocation7 + $0x1], 1 }
 0x206   :  { %719 = vsyncpa [#allocation10], 1 }
 0x207   :  { %720 = vsyncpa [#allocation5], 1 }
 0x208   :  { %722 = vsyncpa [#allocation5 + $0x1], 1 }

</bundles_post_ra>
